<compile_context>
chip_gen: v7x
topology: tpu7x:2x2x1
jax: 0.10.0
libtpu: 0.0.40
codegen_flags: <defaults>
</compile_context>

<pallas_src>
import math
import numpy as np

import jax
import jax.numpy as jnp
from jax.experimental import pallas as pl
from jax.experimental.pallas import tpu as pltpu

# ---------------------------- configuration --------------------------------
SAMPLE_RATE = 16000
N_FFT = 400
WIN_LENGTH = int(round(SAMPLE_RATE / 1000.0 * 25))   # 400
HOP_LENGTH = int(round(SAMPLE_RATE / 1000.0 * 10))   # 160
N_STFT = N_FFT // 2 + 1                              # 201
N_MELS = 40
F_MIN = 0.0
F_MAX = SAMPLE_RATE / 2.0
AMIN = 1e-10
TOP_DB = 80.0
MULTIPLIER = 10.0                                    # power_spectrogram == 2
DB_MULTIPLIER = math.log10(max(AMIN, 1.0))           # = 0.0 (ref_value = 1.0)
DB_SCALE = MULTIPLIER / math.log(10.0)               # 10/ln(10): dB = DB_SCALE*ln(.)

# Padded / tiled sizes for lane-dense MXU work.
N_PAD_STFT = 256            # each of re/im padded to 256 lanes
DFT_WIDTH = 2 * N_PAD_STFT  # 512-wide fused [cos | sin] matmul
N_MELS_PAD = 64             # mel output padded to 64 lanes (40 real)
TM_MAX = 1024               # max frames per grid step


def _ceil_to(x, m):
    return ((x + m - 1) // m) * m


# ------------------------- parameter construction --------------------------
def _to_mel(hz):
    return 2595.0 * math.log10(1.0 + hz / 700.0)


def make_hamming_window():
    """torch.hamming_window(WIN_LENGTH) (periodic=True by default)."""
    n = np.arange(WIN_LENGTH, dtype=np.float64)
    return 0.54 - 0.46 * np.cos(2.0 * np.pi * n / WIN_LENGTH)   # (n_fft,)


def make_fbank_matrix():
    """Triangular mel filterbank [n_stft, n_mels] (SpeechBrain semantics)."""
    mel = np.linspace(_to_mel(F_MIN), _to_mel(F_MAX), N_MELS + 2)
    hz = 700.0 * (10.0 ** (mel / 2595.0) - 1.0)
    band = (hz[1:] - hz[:-1])[:-1]          # (n_mels,)
    f_central = hz[1:-1]                    # (n_mels,)
    all_freqs = np.linspace(0.0, SAMPLE_RATE // 2, N_STFT)  # (n_stft,)

    slope = (all_freqs[None, :] - f_central[:, None]) / band[:, None]
    left = slope + 1.0
    right = -slope + 1.0
    fbank = np.maximum(0.0, np.minimum(left, right))        # (n_mels, n_stft)
    return fbank.T.astype(np.float32)                       # (n_stft, n_mels)


def make_dft_matrices():
    """Unwindowed one-sided DFT matrices (for the float64 reference)."""
    n = np.arange(N_FFT, dtype=np.float64)
    k = np.arange(N_STFT, dtype=np.float64)
    ang = 2.0 * np.pi * np.outer(n, k) / N_FFT
    return np.cos(ang), -np.sin(ang)                         # (n_fft, n_stft) each


def make_windowed_dft_matrix():
    """Fused, window-folded DFT matrix [n_fft, 512] = [w*cos | 0 | w*(-sin) | 0]."""
    cos_mat, sin_mat = make_dft_matrices()
    w = make_hamming_window()[:, None]                       # (n_fft, 1)
    dft = np.zeros((N_FFT, DFT_WIDTH), dtype=np.float32)
    dft[:, :N_STFT] = (w * cos_mat).astype(np.float32)
    dft[:, N_PAD_STFT:N_PAD_STFT + N_STFT] = (w * sin_mat).astype(np.float32)
    return dft


def make_fbank_matrix_padded():
    """Mel filterbank zero-padded to (256, 64) for lane-dense matmul."""
    fb = make_fbank_matrix()                                 # (n_stft, n_mels)
    fb_pad = np.zeros((N_PAD_STFT, N_MELS_PAD), dtype=np.float32)
    fb_pad[:N_STFT, :N_MELS] = fb
    return fb_pad


# ------------------------------ Pallas kernel -------------------------------
def fbank_kernel(frames_ref, dft_ref, fb_ref, out_ref, rowmax_ref):
    # frames_ref: (TM, 400) bf16   dft_ref: (400, 512) bf16 [w*cos | w*(-sin)]
    # fb_ref:     (256, 64) f32    out_ref: (TM, 64) f32   rowmax_ref: (TM, 1) f32

    # Fused windowed one-sided DFT (real | imag) in one MXU matmul, f32 accum.
    spec = jnp.dot(frames_ref[...], dft_ref[...],
                   preferred_element_type=jnp.float32)        # (TM, 512)
    re = spec[:, :N_PAD_STFT]
    im = spec[:, N_PAD_STFT:]
    power = re * re + im * im                                 # (TM, 256), f32

    # Mel filterbank projection; kept in f32 (tiny matmul) for parity.
    mel = jnp.dot(power, fb_ref[...],
                  preferred_element_type=jnp.float32)         # (TM, 64)

    # amplitude_to_DB (db_multiplier == 0, so the subtract is dropped).
    x_db = DB_SCALE * jnp.log(jnp.maximum(mel, AMIN))
    out_ref[...] = x_db

    # Per-row max side output for the wrapper's top_db floor. Padded mel
    # lanes (cols 40..63) are exactly 10*log10(amin) = -100 dB (fbank cols are
    # zero), and every real lane is >= -100 dB, so the max over all 64 lanes
    # equals the max over the 40 real mels.
    rowmax_ref[...] = jnp.max(x_db, axis=-1, keepdims=True)


# ------------------------------ wrapper -------------------------------------
def fbank_forward(wav, dft_mat, fbank_mat):
    """wav: [B, T] float32 -> fbanks [B, F, n_mels] float32."""
    B, T = wav.shape
    pad = N_FFT // 2
    n_frames = 1 + T // HOP_LENGTH
    M = B * n_frames

    # Tile the flattened frame axis: as large as possible (amortize per-step
    # overhead, long DMAs) but keep >= 2 grid steps so v7x's two TensorCores
    # both get work; tiles are multiples of 8 (sublane constraint).
    tm = min(TM_MAX, _ceil_to(max(-(-M // 2), 1), 8))
    m_pad = _ceil_to(M, tm)
    grid = m_pad // tm

    # center=True constant padding; cast to bf16 BEFORE the gather so the
    # framed matrix is emitted directly in bf16 (halves input-path HBM bytes).
    x = jnp.pad(wav, ((0, 0), (pad, pad))).astype(jnp.bfloat16)

    # Clamped row indices -> the gather directly produces the padded
    # (m_pad, n_fft) bf16 frame matrix; padded rows duplicate the last real
    # frame and are sliced off after the kernel.
    # TODO(synk): for long-audio workloads, do the framing in-kernel (DMA a
    # contiguous tm*HOP + (N_FFT-HOP) sample window per tile and assemble the
    # (tm, 400) frames from shifted slices) to avoid the ~2.5x overlapping
    # gather HBM blowup; acceptable for short clips.
    row = jnp.minimum(jnp.arange(m_pad), M - 1)
    b_idx = row // n_frames
    f_idx = row % n_frames
    col = f_idx[:, None] * HOP_LENGTH + jnp.arange(N_FFT)[None, :]
    frames = x[b_idx[:, None], col]                           # (m_pad, 400) bf16

    out_db, row_max = pl.pallas_call(
        fbank_kernel,
        out_shape=(
            jax.ShapeDtypeStruct((m_pad, N_MELS_PAD), jnp.float32),
            jax.ShapeDtypeStruct((m_pad, 1), jnp.float32),
        ),
        grid=(grid,),
        in_specs=[
            pl.BlockSpec((tm, N_FFT), lambda i: (i, 0)),
            # Grid-invariant operands: single-buffered (second pipeline
            # buffer is dead weight for a constant index_map).
            pl.BlockSpec((N_FFT, DFT_WIDTH), lambda i: (0, 0),
                         pipeline_mode=pl.Buffered(1)),
            pl.BlockSpec((N_PAD_STFT, N_MELS_PAD), lambda i: (0, 0),
                         pipeline_mode=pl.Buffered(1)),
        ],
        out_specs=(
            pl.BlockSpec((tm, N_MELS_PAD), lambda i: (i, 0)),
            pl.BlockSpec((tm, 1), lambda i: (i, 0)),
        ),
        compiler_params=pltpu.CompilerParams(
            dimension_semantics=("parallel",),
            vmem_limit_bytes=32 * 1024 * 1024,
        ),
    )(frames, dft_mat, fbank_mat)

    # Un-pad, reshape back to (B, F, n_mels).
    x_db = out_db[:M, :N_MELS].reshape(B, n_frames, N_MELS)

    # Per-utterance top_db floor from the tiny (M, 1) per-row max output
    # (avoids re-reading the full padded dB tensor just to get a (B,) max).
    utt_max = jnp.max(row_max[:M, 0].reshape(B, n_frames), axis=-1)
    floor = utt_max - TOP_DB
    return jnp.maximum(x_db, floor[:, None, None])


# ----------------------------- reference (numpy) ----------------------------
def fbank_reference(wav_np):
    cos_np, sin_np = make_dft_matrices()
    window_np = make_hamming_window()
    fb_np = make_fbank_matrix().astype(np.float64)

    B, T = wav_np.shape
    pad = N_FFT // 2
    x = np.pad(wav_np.astype(np.float64), ((0, 0), (pad, pad)))
    n_frames = 1 + T // HOP_LENGTH
    idx = np.arange(n_frames)[:, None] * HOP_LENGTH + np.arange(N_FFT)[None, :]
    frames = x[:, idx]                                        # (B, F, n_fft)
    xw = frames * window_np[None, None, :]
    re = xw @ cos_np
    im = xw @ sin_np
    power = re * re + im * im
    mel = power @ fb_np
    x_db = MULTIPLIER * np.log10(np.maximum(mel, AMIN))
    x_db = x_db - MULTIPLIER * DB_MULTIPLIER
    floor = x_db.max(axis=(-2, -1), keepdims=True) - TOP_DB
    return np.maximum(x_db, floor)


# --------------------------------- main --------------------------------------
if __name__ == "__main__":
    key = jax.random.PRNGKey(0)
    B, T = 2, 3200                                # 0.2 s of 16 kHz audio -> 21 frames
    wav = jax.random.normal(key, (B, T), dtype=jnp.float32)

    dft_mat = jnp.asarray(make_windowed_dft_matrix(), dtype=jnp.bfloat16)
    fbank_mat = jnp.asarray(make_fbank_matrix_padded(), dtype=jnp.float32)

    out = fbank_forward(wav, dft_mat, fbank_mat)
    out = jax.block_until_ready(out)

    n_frames = 1 + T // HOP_LENGTH
    assert out.shape == (B, n_frames, N_MELS), out.shape
    assert bool(jnp.all(jnp.isfinite(out)))

    # Sanity check against a float64 numpy reference (bf16 MXU inputs for the
    # DFT; mel matmul and log path kept in f32).
    ref = fbank_reference(np.asarray(wav))
    max_diff = float(np.max(np.abs(np.asarray(out, dtype=np.float64) - ref)))
    assert max_diff < 2.0, f"max |diff| in dB too large: {max_diff}"

    print("KERNEL_OK")
</pallas_src>

<mosaic_0001>
module attributes {stable_mosaic.version = 11 : i64} {
  func.func @fbank_kernel(%arg0: i32, %arg1: memref<24x400xbf16, #tpu.memory_space<vmem>>, %arg2: memref<400x512xbf16, #tpu.memory_space<vmem>>, %arg3: memref<256x64xf32, #tpu.memory_space<vmem>>, %arg4: memref<24x64xf32, #tpu.memory_space<vmem>>, %arg5: memref<24x1xf32, #tpu.memory_space<vmem>>) attributes {dimension_semantics = [#tpu.dimension_semantics<parallel>], iteration_bounds = array<i64: 2>, scalar_prefetch = 0 : i64, scratch_operands = 0 : i64, tpu.core_type = #tpu.core_type<tc>, window_params = [{transform_indices = @transform_0, window_bounds = array<i64: 24, 400>}, {pipeline_mode = #tpu.pipeline_mode<synchronous>, transform_indices = @transform_1, window_bounds = array<i64: 400, 512>}, {pipeline_mode = #tpu.pipeline_mode<synchronous>, transform_indices = @transform_2, window_bounds = array<i64: 256, 64>}, {transform_indices = @transform_3, window_bounds = array<i64: 24, 64>}, {transform_indices = @transform_4, window_bounds = array<i64: 24, 1>}]} {
    %c0 = arith.constant 0 : index
    %c0_0 = arith.constant 0 : index
    %0 = vector.load %arg1[%c0, %c0_0] : memref<24x400xbf16, #tpu.memory_space<vmem>>, vector<24x400xbf16>
    %c0_1 = arith.constant 0 : index
    %c0_2 = arith.constant 0 : index
    %1 = vector.load %arg2[%c0_1, %c0_2] : memref<400x512xbf16, #tpu.memory_space<vmem>>, vector<400x512xbf16>
    %cst = arith.constant dense<0.000000e+00> : vector<24x512xf32>
    %2 = tpu.matmul %0, %1, %cst {dimension_numbers = #tpu.dot_dimension_numbers<[1], [0], [0], [1], [0, 0, 1, 1], [], []>} : vector<24x400xbf16>, vector<400x512xbf16>, vector<24x512xf32> -> vector<24x512xf32>
    %3 = vector.extract_strided_slice %2 {offsets = [0, 0], sizes = [24, 256], strides = [1, 1]} : vector<24x512xf32> to vector<24x256xf32>
    %4 = vector.extract_strided_slice %2 {offsets = [0, 256], sizes = [24, 256], strides = [1, 1]} : vector<24x512xf32> to vector<24x256xf32>
    %5 = arith.mulf %3, %3 : vector<24x256xf32>
    %6 = arith.mulf %4, %4 : vector<24x256xf32>
    %7 = arith.addf %5, %6 : vector<24x256xf32>
    %c0_3 = arith.constant 0 : index
    %c0_4 = arith.constant 0 : index
    %8 = vector.load %arg3[%c0_3, %c0_4] : memref<256x64xf32, #tpu.memory_space<vmem>>, vector<256x64xf32>
    %cst_5 = arith.constant dense<0.000000e+00> : vector<24x64xf32>
    %9 = tpu.matmul %7, %8, %cst_5 {dimension_numbers = #tpu.dot_dimension_numbers<[1], [0], [0], [1], [0, 0, 1, 1], [], []>} : vector<24x256xf32>, vector<256x64xf32>, vector<24x64xf32> -> vector<24x64xf32>
    %cst_6 = arith.constant 1.000000e-10 : f32
    %10 = vector.broadcast %cst_6 : f32 to vector<24x64xf32>
    %11 = arith.maximumf %9, %10 : vector<24x64xf32>
    %12 = math.log %11 : vector<24x64xf32>
    %cst_7 = arith.constant 4.34294462 : f32
    %13 = vector.broadcast %cst_7 : f32 to vector<24x64xf32>
    %14 = arith.mulf %13, %12 : vector<24x64xf32>
    %c0_8 = arith.constant 0 : index
    %c0_9 = arith.constant 0 : index
    %15 = vector.load %arg4[%c0_8, %c0_9] : memref<24x64xf32, #tpu.memory_space<vmem>>, vector<24x64xf32>
    tpu.vector_store %arg4[%c0_8, %c0_9], %14 {strides = array<i32>} : memref<24x64xf32, #tpu.memory_space<vmem>>, vector<24x64xf32>,
    %cst_10 = arith.constant dense<0xFF800000> : vector<24xf32>
    %16 = vector.multi_reduction <maximumf>, %14, %cst_10 [1] : vector<24x64xf32> to vector<24xf32>
    %17 = vector.shape_cast %16 : vector<24xf32> to vector<24x1xf32>
    %c0_11 = arith.constant 0 : index
    %c0_12 = arith.constant 0 : index
    %18 = vector.load %arg5[%c0_11, %c0_12] : memref<24x1xf32, #tpu.memory_space<vmem>>, vector<24x1xf32>
    tpu.vector_store %arg5[%c0_11, %c0_12], %17 {strides = array<i32>} : memref<24x1xf32, #tpu.memory_space<vmem>>, vector<24x1xf32>,
    return
  }
  func.func @transform_0(%arg0: i32) -> (i32, i32) {
    %c0_i32 = arith.constant 0 : i32
    %c0_i32_0 = arith.constant 0 : i32
    return %arg0, %c0_i32 : i32, i32
  }
  func.func @transform_1(%arg0: i32) -> (i32, i32) {
    %c0_i32 = arith.constant 0 : i32
    %c0_i32_0 = arith.constant 0 : i32
    %c0_i32_1 = arith.constant 0 : i32
    return %c0_i32, %c0_i32_0 : i32, i32
  }
  func.func @transform_2(%arg0: i32) -> (i32, i32) {
    %c0_i32 = arith.constant 0 : i32
    %c0_i32_0 = arith.constant 0 : i32
    %c0_i32_1 = arith.constant 0 : i32
    return %c0_i32, %c0_i32_0 : i32, i32
  }
  func.func @transform_3(%arg0: i32) -> (i32, i32) {
    %c0_i32 = arith.constant 0 : i32
    %c0_i32_0 = arith.constant 0 : i32
    return %arg0, %c0_i32 : i32, i32
  }
  func.func @transform_4(%arg0: i32) -> (i32, i32) {
    %c0_i32 = arith.constant 0 : i32
    %c0_i32_0 = arith.constant 0 : i32
    return %arg0, %c0_i32 : i32, i32
  }
}

</mosaic_0001>

<bundles_post_ra>
// kernel: tpu_custom_call.1
= control target key start
LH: loop header
LB: loop body
LE: loop exit
PB: predicated region body
PF: predicated region fallthrough
CT: control target
= control target key end

     0   :  { %10 = vsyncpa [#allocation3], 0  ;;  %s2193_s0 = inlined_call_operand.vmem [shape: bf16[48,400], index: 0, kind: input, shape index: {}]   ;;  %s2194_s1 = inlined_call_operand.hbm [shape: bf16[400,512], index: 1, kind: input, shape index: {}]   ;;  %s2195_s2 = inlined_call_operand.vmem [shape: f32[256,64], index: 2, kind: input, shape index: {}]   ;;  %s2196_s3 = inlined_call_operand.hbm [shape: f32[48,64], index: 3, kind: output, shape index: {0}]   ;;  %s2197_s4 = inlined_call_operand.vmem [shape: f32[48,1], index: 4, kind: output, shape index: {1}]  }
   0x1   :  { %11 = vsyncpa [#allocation4], 0 }
   0x2   :  { %13 = vsyncpa [#allocation4 + $0x1], 0  ;;  %s1941_s15 = smov 0   ;;  %s1943_s16 = smov 0  }
   0x3   :  { %s1945_s17 = smov 0   ;;  %s1947_s18 = smov 0  }
   0x4 LB: > { %s1962_s19 = sadd.s32 4294967295, %s1908_s18   ;;  %s1362_s20 = sadd.s32 4294967294, %s1908_s18   ;;  %s1908_s18 = sphi %s1947_s18, %s2213_s18   ;;  %s1904_s17 = sphi %s1945_s17, %s2212_s17   ;;  %s1900_s16 = sphi %s1943_s16, %s2211_s16   ;;  %s1896_s15 = sphi %s1941_s15, %s2210_s15  }
   0x5   : > { %s1966_s21 = sadd.s32 1, %s1908_s18   ;;  %s94_s22 = sadd.s32 1, %s1904_s17 }
   0x6   : > { %s91_s23 = ssub.s32 %s1908_s18, %s1966_s21  ;;  %p104_p0 = scmp.ne.s32.totalorder %s1904_s17, %s1900_s16 }
   0x7   : > { %p92_p1 = scmp.eq.s32.totalorder %s91_s23, 0  ;;  %p105_p2 = scmp.eq.s32.totalorder %s1962_s19, 1 }
   0x8   : > { %p110_p3 = scmp.ne.s32.totalorder %s1900_s16, %s1896_s15  ;;  %p111_p4 = scmp.eq.s32.totalorder %s1362_s20, 1 }
   0x9   : > { %s1977_s24 = scalar_select %p92_p1, %s1904_s17, %s94_s22  }
   0xa   : > { %p1979_p5 = por %p105_p2, %p104_p0  ;;  %p1983_p6 = por %p111_p4, %p110_p3 }
   0xb   : > { %p1363_p7 = scmp.ge.s32.totalorder %s1908_s18, 1  ;;  %p144_p8 = scmp.lt.s32.totalorder %s1908_s18, 3 }
   0xc   : > { %s2201_s25 = scalar_select %p1979_p5, 1, 0 }
   0xd   : > { %s2202_s26 = scalar_select %p1983_p6, 1, 0 }
   0xe   : > { %p2198_p9 = scmp.eq.s32.totalorder %s1962_s19, 0  ;;  %p1990_p10 = pnand %p1363_p7, %p144_p8 }
   0xf   : > { %s1910_s28 = smov [#allocation2]   ;;  %s1814_s7 = scalar_lea.hbm %s2194_s1, 12800 }
  0x10   : > { %s2203_s27 = scalar_select %p1990_p10, 1, 0 }
  0x11   : > { %s156_s29 = sshll.u32 %s1910_s28, 4  ;;  %p1600_p11 = pneg %p1990_p10  ;;  %s157_s29 = int_to_ptr.vmem [resolvable:$true] %s156_s29 }
  0x12   : > { %p1815_p13 = scmp.ne.s32.totalorder %s2194_s1, %s1814_s7  ;;  %p1821_p3 = scmp.lt.u32.totalorder %s1814_s7, %s2194_s1 }
  0x13   : > { %p1998_p12 = pnand %p2198_p9, %p1600_p11 }
  0x15   : > { %p1816_p0 = pneg %p1998_p12 }
  0x17   : > { %p1817_p1 = pnand %p1816_p0, %p1815_p13 }
  0x19   : > { %p1818_p2 = pneg %p1817_p1 }
  0x1b   : > { %p1823_p4 = pnand %p1821_p3, %p1818_p2 }
  0x1d   : > { %1826 = shalt.err (!%p1823_p4)
}
  0x1e   : > { %s1827_s12 = scalar_lea.vmem %s157_s29, 12800  ;;  %p1835_p9 = scmp.lt.s32.totalorder %s157_s29, %s157_s29 }
  0x1f   : > { %p1828_p7 = scmp.ne.s32.totalorder %s157_s29, %s1827_s12  ;;  %p1836_p6 = scmp.lt.s32.totalorder %s1827_s12, %s1827_s12 }
  0x21   : > { %p1830_p8 = pnand %p1828_p7, %p1816_p0  ;;  %p1837_p5 = por %p1836_p6, %p1835_p9 }
  0x23   : > { %p1831_p11 = pneg %p1830_p8 }
  0x25   : > { %p1838_p10 = pnand %p1837_p5, %p1831_p11 }
  0x27   : > { %1841 = shalt.err (!%p1838_p10)
}
  0x28   : > { %s1911_s13 = smov 256   ;;  %s1912_s14 = smov 16  }
  0x29   : > { %1603 = dma.hbm_to_vmem [thread:$0]  (!%p1998_p12), %s2194_s1, 12800, %s157_s29, [#allocation3], %s1911_s13, %s1911_s13, %s1912_s14  }
  0x2a   : > { %p2205_p13 = scmp.ne.s32.totalorder %s2203_s27, 0 }
  0x2b   : > { %p2206_p1 = scmp.eq.s32.totalorder (!%p2205_p13), %s1962_s19, 0 }
  0x2c   : > { %185 = sbr.rel (%p2205_p13) target bundleno = 755 (0x2f3), region = 32 }
  0x33   : > { %1887 = dma.done.wait (%p2206_p1), [#allocation3], 12800   ;;  %p2207_p0 = pmov %p2206_p1 }
  0x34   : > { %v1648_v0 = vld [vmem:[#allocation2 + $0x4] ss:$16 sps:$4 sm:$0xff]   ;;  %v1650_v1 = vld [vmem:[#allocation2 + $0xc] ss:$16 sps:$4 sm:$0xff]   ;;  %v1652_v2 = vld [vmem:[#allocation2] ss:$16 sps:$4 sm:$0xff]  }
  0x35   : > { %1889 = vsyncadd (%p2207_p0), [#allocation3], 4294954496  ;;  %877 = vmatprep.subr.bf16.mxu0 %v1648_v0  ;;  %v1653_v3 = vld [vmem:[#allocation2 + $0x8] ss:$16 sps:$4 sm:$0xff]   ;;  %979 = vmatprep.subr.bf16.mxu1 %v1650_v1  ;;  %v1654_v4 = vld [vmem:[#allocation2 + $0x24] ss:$16 sps:$4 sm:$0xff]  }
  0x36   : > { %878 = vmatpush1.bf16.msra.mxu0 %v1652_v2  ;;  %980 = vmatpush1.bf16.msra.mxu1 %v1653_v3  ;;  %v1656_v5 = vld [vmem:[#allocation2 + $0x2c] ss:$16 sps:$4 sm:$0xff]   ;;  %v1658_v6 = vld [vmem:[#allocation2 + $0x20] ss:$16 sps:$4 sm:$0xff]   ;;  %v1659_v7 = vld [vmem:[#allocation2 + $0x28] ss:$16 sps:$4 sm:$0xff]  }
  0x37   : > { %879 = vmatprep.subr.bf16.mxu0 %v1654_v4  ;;  %981 = vmatprep.subr.bf16.mxu1 %v1656_v5  ;;  %v1660_v8 = vld [vmem:[#allocation2 + $0x44] ss:$16 sps:$4 sm:$0xff]   ;;  %v1662_v9 = vld [vmem:[#allocation2 + $0x4c] ss:$16 sps:$4 sm:$0xff]   ;;  %v1664_v10 = vld [vmem:[#allocation2 + $0x40] ss:$16 sps:$4 sm:$0xff]  }
  0x38   : > { %v1665_v11 = vld [vmem:[#allocation2 + $0x48] ss:$16 sps:$4 sm:$0xff]   ;;  %v1666_v12 = vld [vmem:[#allocation2 + $0x64] ss:$16 sps:$4 sm:$0xff]   ;;  %v1668_v13 = vld [vmem:[#allocation2 + $0x6c] ss:$16 sps:$4 sm:$0xff]  }
  0x39   : > { %v1670_v14 = vld [vmem:[#allocation2 + $0x60] ss:$16 sps:$4 sm:$0xff]   ;;  %v1671_v15 = vld [vmem:[#allocation2 + $0x68] ss:$16 sps:$4 sm:$0xff]   ;;  %v1672_v16 = vld [vmem:[#allocation2 + $0x84] ss:$16 sps:$4 sm:$0xff]  }
  0x3a   : > { %880 = vmatpush1.bf16.msra.mxu0 %v1658_v6  ;;  %982 = vmatpush1.bf16.msra.mxu1 %v1659_v7  ;;  %v1674_v17 = vld [vmem:[#allocation2 + $0x8c] ss:$16 sps:$4 sm:$0xff]   ;;  %v1676_v18 = vld [vmem:[#allocation2 + $0x80] ss:$16 sps:$4 sm:$0xff]   ;;  %v1677_v19 = vld [vmem:[#allocation2 + $0x88] ss:$16 sps:$4 sm:$0xff]  }
  0x3b   : > { %881 = vmatprep.subr.bf16.mxu0 %v1660_v8  ;;  %983 = vmatprep.subr.bf16.mxu1 %v1662_v9  ;;  %v1678_v20 = vld [vmem:[#allocation2 + $0xa4] ss:$16 sps:$4 sm:$0xff]   ;;  %v1680_v21 = vld [vmem:[#allocation2 + $0xac] ss:$16 sps:$4 sm:$0xff]   ;;  %v1682_v22 = vld [vmem:[#allocation2 + $0xa0] ss:$16 sps:$4 sm:$0xff]  }
  0x3c   : > { %v1683_v23 = vld [vmem:[#allocation2 + $0xa8] ss:$16 sps:$4 sm:$0xff]   ;;  %v1684_v24 = vld [vmem:[#allocation2 + $0xc4] ss:$16 sps:$4 sm:$0xff]   ;;  %v1686_v25 = vld [vmem:[#allocation2 + $0xcc] ss:$16 sps:$4 sm:$0xff]  }
  0x3d   : > { %v1688_v26 = vld [vmem:[#allocation2 + $0xc0] ss:$16 sps:$4 sm:$0xff]   ;;  %v1689_v27 = vld [vmem:[#allocation2 + $0xc8] ss:$16 sps:$4 sm:$0xff]   ;;  %v1690_v28 = vld [vmem:[#allocation2 + $0xe4] ss:$16 sps:$4 sm:$0xff]  }
  0x3e   : > { %882 = vmatpush1.bf16.msra.mxu0 %v1664_v10  ;;  %984 = vmatpush1.bf16.msra.mxu1 %v1665_v11  ;;  %v1692_v29 = vld [vmem:[#allocation2 + $0xec] ss:$16 sps:$4 sm:$0xff]   ;;  %s217_s23 = smul.u32 3, %s1962_s19  ;;  %v1694_v30 = vld [vmem:[#allocation2 + $0xe0] ss:$16 sps:$4 sm:$0xff]   ;;  %vm870_vm0 = vcmask 130048  }
  0x3f   : > { %883 = vmatprep.subr.bf16.mxu0 %v1666_v12  ;;  %985 = vmatprep.subr.bf16.mxu1 %v1668_v13  ;;  %v1695_v31 = vld [vmem:[#allocation2 + $0xe8] ss:$16 sps:$4 sm:$0xff]   ;;  %v1696_v32 = vld [vmem:[#allocation2 + $0x104] ss:$16 sps:$4 sm:$0xff]   ;;  %v1698_v33 = vld [vmem:[#allocation2 + $0x10c] ss:$16 sps:$4 sm:$0xff]  }
  0x40   : > { %p218_p5 = scmp.lt.s32.totalorder %s217_s23, 5  ;;  %v1700_v34 = vld [vmem:[#allocation2 + $0x100] ss:$16 sps:$4 sm:$0xff]   ;;  %v1701_v35 = vld [vmem:[#allocation2 + $0x108] ss:$16 sps:$4 sm:$0xff]   ;;  %s207_s5 = sand.u32 1, %s1900_s16  }
  0x41   : > { %v1702_v36 = vld [vmem:[#allocation2 + $0x124] ss:$16 sps:$4 sm:$0xff]   ;;  %v1704_v37 = vld [vmem:[#allocation2 + $0x12c] ss:$16 sps:$4 sm:$0xff]   ;;  %v1706_v38 = vld [vmem:[#allocation2 + $0x120] ss:$16 sps:$4 sm:$0xff]  }
  0x42   : > { %884 = vmatpush1.bf16.msra.mxu0 %v1670_v14  ;;  %986 = vmatpush1.bf16.msra.mxu1 %v1671_v15  ;;  %s2215_s23 = smov (!%p218_p5, %s217_s23), 5  ;;  %v1707_v39 = vld [vmem:[#allocation2 + $0x128] ss:$16 sps:$4 sm:$0xff]   ;;  %v1708_v40 = vld [vmem:[#allocation2 + $0x144] ss:$16 sps:$4 sm:$0xff]   ;;  %s1593_s6 = smul.u32 24, %s207_s5 }
  0x43   : > { %885 = vmatprep.subr.bf16.mxu0 %v1672_v16  ;;  %987 = vmatprep.subr.bf16.mxu1 %v1674_v17  ;;  %v1710_v41 = vld [vmem:[#allocation2 + $0x14c] ss:$16 sps:$4 sm:$0xff]   ;;  %s1486_s27 = sshll.u32 %s2215_s23, 4  ;;  %v1712_v42 = vld [vmem:[#allocation2 + $0x140] ss:$16 sps:$4 sm:$0xff]   ;;  %vm1223_vm1 = vcmask 523264  }
  0x44   : > { %v1713_v43 = vld [vmem:[#allocation2 + $0x148] ss:$16 sps:$4 sm:$0xff]   ;;  %v1714_v44 = vld [vmem:[#allocation2 + $0x164] ss:$16 sps:$4 sm:$0xff]   ;;  %s2031_s30 = scalar_lea.vmem %s2193_s0, %s1486_s27  ;;  %v1716_v45 = vld [vmem:[#allocation2 + $0x16c] ss:$16 sps:$4 sm:$0xff]  }
  0x45   : > { %v1718_v46 = vld [vmem:[#allocation2 + $0x160] ss:$16 sps:$4 sm:$0xff]   ;;  %v1719_v47 = vld [vmem:[#allocation2 + $0x168] ss:$16 sps:$4 sm:$0xff]   ;;  %v1746_v48 = vld [vmem:[%s2031_s30 + $0x4] ss:$16 sps:$4 sm:$0xff]  }
  0x46   : > { %886 = vmatpush1.bf16.msra.mxu0 %v1676_v18  ;;  %988 = vmatpush1.bf16.msra.mxu1 %v1677_v19  ;;  %v1720_v49 = vld [vmem:[#allocation2 + $0x184] ss:$16 sps:$4 sm:$0xff]   ;;  %v1722_v50 = vld [vmem:[#allocation2 + $0x18c] ss:$16 sps:$4 sm:$0xff]   ;;  %v1724_v51 = vld [vmem:[#allocation2 + $0x180] ss:$16 sps:$4 sm:$0xff]  }
  0x47   : > { %887 = vmatprep.subr.bf16.mxu0 %v1678_v20  ;;  %989 = vmatprep.subr.bf16.mxu1 %v1680_v21  ;;  %v1725_v52 = vld [vmem:[#allocation2 + $0x188] ss:$16 sps:$4 sm:$0xff]   ;;  %v1726_v53 = vld [vmem:[#allocation2 + $0x1a4] ss:$16 sps:$4 sm:$0xff]   ;;  %v1728_v54 = vld [vmem:[#allocation2 + $0x1ac] ss:$16 sps:$4 sm:$0xff]  }
  0x48   : > { %909 = vmatprep.mubr.bf16.mxu0 %v1746_v48  ;;  %1011 = vmatprep.mubr.bf16.mxu1 %v1746_v48  ;;  %v1730_v55 = vld [vmem:[#allocation2 + $0x1a0] ss:$16 sps:$4 sm:$0xff]   ;;  %v1731_v56 = vld [vmem:[#allocation2 + $0x1a8] ss:$16 sps:$4 sm:$0xff]   ;;  %v1732_v57 = vld [vmem:[#allocation2 + $0x1c4] ss:$16 sps:$4 sm:$0xff]  }
  0x49   : > { %v1734_v58 = vld [vmem:[#allocation2 + $0x1cc] ss:$16 sps:$4 sm:$0xff]   ;;  %v1736_v59 = vld [vmem:[#allocation2 + $0x1c0] ss:$16 sps:$4 sm:$0xff]   ;;  %v1737_v60 = vld [vmem:[#allocation2 + $0x1c8] ss:$16 sps:$4 sm:$0xff]  }
  0x4a   : > { %888 = vmatpush1.bf16.msra.mxu0 %v1682_v22  ;;  %990 = vmatpush1.bf16.msra.mxu1 %v1683_v23  ;;  %v1738_v61 = vld [vmem:[#allocation2 + $0x1e4] ss:$16 sps:$4 sm:$0xff]   ;;  %v1740_v62 = vld [vmem:[#allocation2 + $0x1ec] ss:$16 sps:$4 sm:$0xff]   ;;  %v1742_v63 = vld [vmem:[#allocation2 + $0x1e0] ss:$16 sps:$4 sm:$0xff]  }
  0x4b   : > { %889 = vmatprep.subr.bf16.mxu0 %v1684_v24  ;;  %991 = vmatprep.subr.bf16.mxu1 %v1686_v25  ;;  %v1743_v0 = vld [vmem:[#allocation2 + $0x1e8] ss:$16 sps:$4 sm:$0xff]   ;;  %v1749_v1 = vld [vmem:[#allocation2 + $0x204] ss:$16 sps:$4 sm:$0xff]   ;;  %v1752_v2 = vld [vmem:[#allocation2 + $0x20c] ss:$16 sps:$4 sm:$0xff]  }
  0x4c   : > { %v1744_v3 = vld [vmem:[%s2031_s30] ss:$16 sps:$4 sm:$0xff]   ;;  %v1750_v6 = vld [vmem:[#allocation2 + $0x208] ss:$16 sps:$4 sm:$0xff]   ;;  %v1755_v7 = vld [vmem:[#allocation2 + $0x224] ss:$16 sps:$4 sm:$0xff]  }
  0x4d   : > { %v1747_v4 = vld [vmem:[#allocation2 + $0x200] ss:$16 sps:$4 sm:$0xff]   ;;  %v1758_v8 = vld [vmem:[#allocation2 + $0x22c] ss:$16 sps:$4 sm:$0xff]   ;;  %v1756_v11 = vld [vmem:[#allocation2 + $0x228] ss:$16 sps:$4 sm:$0xff]  }
  0x4e   : > { %890 = vmatpush1.bf16.msra.mxu0 %v1688_v26  ;;  %992 = vmatpush1.bf16.msra.mxu1 %v1689_v27  ;;  %v236_v5 = vld [vmem:[%s2031_s30 + $0x20] sm:$0xff]  ;;  %v1764_v13 = vld [vmem:[#allocation2 + $0x24c] ss:$16 sps:$4 sm:$0xff]   ;;  %v1762_v16 = vld [vmem:[#allocation2 + $0x248] ss:$16 sps:$4 sm:$0xff]   ;;  %s209_s7 = scalar_lea.vmem [#allocation5], %s1593_s6 }
  0x4f   : > { %891 = vmatprep.subr.bf16.mxu0 %v1690_v28  ;;  %993 = vmatprep.subr.bf16.mxu1 %v1692_v29  ;;  %v1376_v9 = vcombine.high %v236_v5, %v236_v5  ;;  %v1753_v10 = vld [vmem:[#allocation2 + $0x220] ss:$16 sps:$4 sm:$0xff]   ;;  %v1761_v12 = vld [vmem:[#allocation2 + $0x244] ss:$16 sps:$4 sm:$0xff]   ;;  %v1375_v14 = vcombine.low %v236_v5, %v236_v5  ;;  %v1770_v18 = vld [vmem:[#allocation2 + $0x26c] ss:$16 sps:$4 sm:$0xff]  }
  0x50   : > { %v1759_v15 = vld [vmem:[#allocation2 + $0x240] ss:$16 sps:$4 sm:$0xff]   ;;  %v1767_v17 = vld [vmem:[#allocation2 + $0x264] ss:$16 sps:$4 sm:$0xff]   ;;  %v1805_v19 = vld [vmem:[%s2031_s30 + $0xc] ss:$16 sps:$4 sm:$0xff]  }
  0x51   : > { %v1765_v20 = vld [vmem:[#allocation2 + $0x260] ss:$16 sps:$4 sm:$0xff]   ;;  %v1768_v21 = vld [vmem:[#allocation2 + $0x268] ss:$16 sps:$4 sm:$0xff]   ;;  %v1773_v22 = vld [vmem:[#allocation2 + $0x284] ss:$16 sps:$4 sm:$0xff]  }
  0x52   : > { %892 = vmatpush1.bf16.msra.mxu0 %v1694_v30  ;;  %994 = vmatpush1.bf16.msra.mxu1 %v1695_v31  ;;  %v1776_v23 = vld [vmem:[#allocation2 + $0x28c] ss:$16 sps:$4 sm:$0xff]   ;;  %v1771_v24 = vld [vmem:[#allocation2 + $0x280] ss:$16 sps:$4 sm:$0xff]   ;;  %v1774_v25 = vld [vmem:[#allocation2 + $0x288] ss:$16 sps:$4 sm:$0xff]  }
  0x53   : > { %893 = vmatprep.subr.bf16.mxu0 %v1696_v32  ;;  %995 = vmatprep.subr.bf16.mxu1 %v1698_v33  ;;  %v1779_v26 = vld [vmem:[#allocation2 + $0x2a4] ss:$16 sps:$4 sm:$0xff]   ;;  %v1782_v27 = vld [vmem:[#allocation2 + $0x2ac] ss:$16 sps:$4 sm:$0xff]   ;;  %v1777_v28 = vld [vmem:[#allocation2 + $0x2a0] ss:$16 sps:$4 sm:$0xff]  }
  0x54   : > { %v1780_v29 = vld [vmem:[#allocation2 + $0x2a8] ss:$16 sps:$4 sm:$0xff]   ;;  %v1785_v30 = vld [vmem:[#allocation2 + $0x2c4] ss:$16 sps:$4 sm:$0xff]   ;;  %v1788_v31 = vld [vmem:[#allocation2 + $0x2cc] ss:$16 sps:$4 sm:$0xff]  }
  0x55   : > { %v1783_v32 = vld [vmem:[#allocation2 + $0x2c0] ss:$16 sps:$4 sm:$0xff]   ;;  %v1786_v33 = vld [vmem:[#allocation2 + $0x2c8] ss:$16 sps:$4 sm:$0xff]   ;;  %s1259_s8 = sshll.u32 %s209_s7, 4  ;;  %s1487_s9 = smul.u32 384, %s1962_s19  ;;  %s2141_s8 = int_to_ptr.vmem [resolvable:$true] %s1259_s8 }
  0x56   : > { %894 = vmatpush1.bf16.msra.mxu0 %v1700_v34  ;;  %996 = vmatpush1.bf16.msra.mxu1 %v1701_v35  ;;  %v1793_v34 = vld [vmem:[#allocation2 + $0x2e4] ss:$16 sps:$4 sm:$0xff]   ;;  %v1796_v35 = vld [vmem:[#allocation2 + $0x2ec] ss:$16 sps:$4 sm:$0xff]   ;;  %v1803_v48 = vld [vmem:[%s2031_s30 + $0x8] ss:$16 sps:$4 sm:$0xff]  }
  0x57   : > { %895 = vmatprep.subr.bf16.mxu0 %v1702_v36  ;;  %997 = vmatprep.subr.bf16.mxu1 %v1704_v37  ;;  %v1791_v36 = vld [vmem:[#allocation2 + $0x2e0] ss:$16 sps:$4 sm:$0xff]   ;;  %v1794_v37 = vld [vmem:[#allocation2 + $0x2e8] ss:$16 sps:$4 sm:$0xff]   ;;  %s2146_s12 = scalar_lea.hbm %s2196_s3, %s1487_s9  ;;  %s2148_s13 = scalar_lea.sflag [#allocation4], %s207_s5 }
  0x58   : > { %v1123_v5 = vld [vmem:[%s2195_s2 + $0xc0] sm:$0xff]  ;;  %s1842_s14 = scalar_lea.vmem %s2141_s8, 384  ;;  %p2208_p9 = scmp.ne.s32.totalorder %s2201_s25, 0 }
  0x59   : > { %p1843_p6 = scmp.ne.s32.totalorder %s2141_s8, %s1842_s14  ;;  %s1913_s20 = smov [#allocation5]  }
  0x5a   : > { %896 = vmatpush1.bf16.msra.mxu0 %v1706_v38  ;;  %998 = vmatpush1.bf16.msra.mxu1 %v1707_v39  ;;  %v1799_v38 = vld [vmem:[#allocation2 + $0x304] ss:$16 sps:$4 sm:$0xff]   ;;  %v1802_v39 = vld [vmem:[#allocation2 + $0x30c] ss:$16 sps:$4 sm:$0xff]   ;;  %s1846_s22 = sshll.u32 %s1913_s20, 4  ;;  %s1847_s22 = int_to_ptr.vmem [resolvable:$false] %s1846_s22 }
  0x5b   : > { %897 = vmatprep.subr.bf16.mxu0 %v1708_v40  ;;  %999 = vmatprep.subr.bf16.mxu1 %v1710_v41  ;;  %v1115_v40 = vld [vmem:[%s2195_s2 + $0x80] sm:$0xff]  ;;  %v1116_v41 = vld [vmem:[%s2195_s2 + $0x88] sm:$0xff]  ;;  %p1844_p10 = pnand %p1843_p6, %p2208_p9  ;;  %s1848_s19 = scalar_lea.vmem %s1847_s22, 768 }
  0x5c   : > { %p1849_p2 = scmp.lt.s32.totalorder %s2141_s8, %s1847_s22  ;;  %p1850_p3 = scmp.lt.s32.totalorder %s1848_s19, %s1842_s14 }
  0x5d   : > { %p1845_p12 = pneg %p1844_p10 }
  0x5e   : > { %898 = vmatpush1.bf16.msra.mxu0 %v1712_v42  ;;  %1000 = vmatpush1.bf16.msra.mxu1 %v1713_v43  ;;  %v1797_v42 = vld [vmem:[#allocation2 + $0x300] ss:$16 sps:$4 sm:$0xff]   ;;  %v1800_v43 = vld [vmem:[#allocation2 + $0x308] ss:$16 sps:$4 sm:$0xff]   ;;  %p1851_p4 = por %p1850_p3, %p1849_p2 }
  0x5f   : > { %899 = vmatprep.subr.bf16.mxu0 %v1714_v44  ;;  %1001 = vmatprep.subr.bf16.mxu1 %v1716_v45  ;;  %v237_v44 = vld [vmem:[%s2031_s30 + $0x28] sm:$0xff]  ;;  %v1529_v45 = vpack.c.bf16 %v1116_v41, %v1115_v40 }
  0x60   : > { %p1852_p7 = pnand %p1851_p4, %p1845_p12 }
  0x62   : > { %900 = vmatpush1.bf16.msra.mxu0 %v1718_v46  ;;  %1002 = vmatpush1.bf16.msra.mxu1 %v1719_v47  ;;  %v1099_v46 = vld [vmem:[%s2195_s2] sm:$0xff]  ;;  %v1100_v47 = vld [vmem:[%s2195_s2 + $0x8] sm:$0xff] }
  0x63   : > { %901 = vmatprep.subr.bf16.mxu0 %v1720_v49  ;;  %1003 = vmatprep.subr.bf16.mxu1 %v1722_v50  ;;  %v1117_v49 = vld [vmem:[%s2195_s2 + $0x90] sm:$0xff]  ;;  %v1118_v50 = vld [vmem:[%s2195_s2 + $0x98] sm:$0xff] }
  0x66   : > { %902 = vmatpush1.bf16.msra.mxu0 %v1724_v51  ;;  %1004 = vmatpush1.bf16.msra.mxu1 %v1725_v52  ;;  %v1378_v51 = vcombine.high %v237_v44, %v237_v44  ;;  %v1531_v52 = vpack.c.bf16 %v1100_v47, %v1099_v46 }
  0x67   : > { %903 = vmatprep.subr.bf16.mxu0 %v1726_v53  ;;  %1005 = vmatprep.subr.bf16.mxu1 %v1728_v54  ;;  %v1533_v53 = vpack.c.bf16 %v1118_v50, %v1117_v49  ;;  %v1101_v54 = vld [vmem:[%s2195_s2 + $0x10] sm:$0xff] }
  0x6a   : > { %904 = vmatpush1.bf16.msra.mxu0 %v1730_v55  ;;  %1006 = vmatpush1.bf16.msra.mxu1 %v1731_v56  ;;  %v1102_v55 = vld [vmem:[%s2195_s2 + $0x18] sm:$0xff]  ;;  %v1119_v56 = vld [vmem:[%s2195_s2 + $0xa0] sm:$0xff] }
  0x6b   : > { %905 = vmatprep.subr.bf16.mxu0 %v1732_v57  ;;  %1007 = vmatprep.subr.bf16.mxu1 %v1734_v58  ;;  %v1120_v57 = vld [vmem:[%s2195_s2 + $0xa8] sm:$0xff]  ;;  %v1535_v58 = vpack.c.bf16 %v1102_v55, %v1101_v54 }
  0x6e   : > { %906 = vmatpush1.bf16.msra.mxu0 %v1736_v59  ;;  %1008 = vmatpush1.bf16.msra.mxu1 %v1737_v60  ;;  %v1537_v59 = vpack.c.bf16 %v1120_v57, %v1119_v56  ;;  %v1103_v60 = vld [vmem:[%s2195_s2 + $0x20] sm:$0xff] }
  0x6f   : > { %907 = vmatprep.subr.bf16.mxu0 %v1738_v61  ;;  %1009 = vmatprep.subr.bf16.mxu1 %v1740_v62  ;;  %v1104_v61 = vld [vmem:[%s2195_s2 + $0x28] sm:$0xff]  ;;  %v1377_v62 = vcombine.low %v237_v44, %v237_v44 }
  0x72   : > { %908 = vmatpush1.bf16.msra.mxu0 %v1742_v63  ;;  %1010 = vmatpush1.bf16.msra.mxu1 %v1743_v0  ;;  %v1121_v63 = vld [vmem:[%s2195_s2 + $0xb0] sm:$0xff]  ;;  %v1122_v0 = vld [vmem:[%s2195_s2 + $0xb8] sm:$0xff] }
  0x73   : > { %928 = vmatprep.subr.bf16.mxu0 %v1749_v1  ;;  %1030 = vmatprep.subr.bf16.mxu1 %v1752_v2  ;;  %v1539_v1 = vpack.c.bf16 %v1104_v61, %v1103_v60  ;;  %v1541_v2 = vpack.c.bf16 %v1122_v0, %v1121_v63 }
  0x75   : > { %910 = vmatmul.mubr.bf16.vlgmr.msra.gmra.mrb[0].mxu0 %v1744_v3  ;;  %1012 = vmatmul.mubr.bf16.vlgmr.msra.gmra.mrb[0].mxu1 %v1744_v3  ;;  %v1105_v3 = vld [vmem:[%s2195_s2 + $0x30] sm:$0xff] }
  0x76   : > { %929 = vmatpush1.bf16.msra.mxu0 %v1747_v4  ;;  %1031 = vmatpush1.bf16.msra.mxu1 %v1750_v6  ;;  %v1106_v4 = vld [vmem:[%s2195_s2 + $0x38] sm:$0xff]  ;;  %v1124_v6 = vld [vmem:[%s2195_s2 + $0xc8] sm:$0xff] }
  0x77   : > { %930 = vmatprep.subr.bf16.mxu0 %v1755_v7  ;;  %1032 = vmatprep.subr.bf16.mxu1 %v1758_v8  ;;  %v1543_v7 = vpack.c.bf16 %v1106_v4, %v1105_v3  ;;  %v1545_v8 = vpack.c.bf16 %v1124_v6, %v1123_v5 }
  0x78   : > { %919 = vmatprep.mubr.bf16.mxu0 %v1376_v9  ;;  %1021 = vmatprep.mubr.bf16.mxu1 %v1376_v9  ;;  %v1107_v9 = vld [vmem:[%s2195_s2 + $0x40] sm:$0xff] }
  0x7a   : > { %931 = vmatpush1.bf16.msra.mxu0 %v1753_v10  ;;  %1033 = vmatpush1.bf16.msra.mxu1 %v1756_v11  ;;  %v1108_v10 = vld [vmem:[%s2195_s2 + $0x48] sm:$0xff]  ;;  %v1125_v11 = vld [vmem:[%s2195_s2 + $0xd0] sm:$0xff] }
  0x7b   : > { %932 = vmatprep.subr.bf16.mxu0 %v1761_v12  ;;  %1034 = vmatprep.subr.bf16.mxu1 %v1764_v13  ;;  %v1126_v12 = vld [vmem:[%s2195_s2 + $0xd8] sm:$0xff]  ;;  %v1547_v13 = vpack.c.bf16 %v1108_v10, %v1107_v9 }
  0x7d   : > { %920 = vmatmul.mubr.bf16.gmra.mrb[4].mxu0 %v1375_v14  ;;  %1022 = vmatmul.mubr.bf16.gmra.mrb[4].mxu1 %v1375_v14  ;;  %v1549_v14 = vpack.c.bf16 %v1126_v12, %v1125_v11 }
  0x7e   : > { %933 = vmatpush1.bf16.msra.mxu0 %v1759_v15  ;;  %1035 = vmatpush1.bf16.msra.mxu1 %v1762_v16  ;;  %v1109_v15 = vld [vmem:[%s2195_s2 + $0x50] sm:$0xff]  ;;  %v1110_v16 = vld [vmem:[%s2195_s2 + $0x58] sm:$0xff] }
  0x7f   : > { %934 = vmatprep.subr.bf16.mxu0 %v1767_v17  ;;  %1036 = vmatprep.subr.bf16.mxu1 %v1770_v18  ;;  %v1127_v17 = vld [vmem:[%s2195_s2 + $0xe0] sm:$0xff]  ;;  %v1128_v18 = vld [vmem:[%s2195_s2 + $0xe8] sm:$0xff] }
  0x80   : > { %1479 = vmatprep.mubr.msk.bf16.mxu0 %vm870_vm0, %v1805_v19  ;;  %1481 = vmatprep.mubr.msk.bf16.mxu1 %vm870_vm0, %v1805_v19  ;;  %v1551_v19 = vpack.c.bf16 %v1110_v16, %v1109_v15 }
  0x82   : > { %935 = vmatpush1.bf16.msra.mxu0 %v1765_v20  ;;  %1037 = vmatpush1.bf16.msra.mxu1 %v1768_v21  ;;  %v1553_v20 = vpack.c.bf16 %v1128_v18, %v1127_v17  ;;  %v1111_v21 = vld [vmem:[%s2195_s2 + $0x60] sm:$0xff] }
  0x83   : > { %936 = vmatprep.subr.bf16.mxu0 %v1773_v22  ;;  %1038 = vmatprep.subr.bf16.mxu1 %v1776_v23  ;;  %v1112_v22 = vld [vmem:[%s2195_s2 + $0x68] sm:$0xff] }
  0x84   : > { %v1555_v23 = vpack.c.bf16 %v1112_v22, %v1111_v21 }
  0x86   : > { %937 = vmatpush1.bf16.msra.mxu0 %v1771_v24  ;;  %1039 = vmatpush1.bf16.msra.mxu1 %v1774_v25  ;;  %v1129_v24 = vld [vmem:[%s2195_s2 + $0xf0] sm:$0xff]  ;;  %v1130_v25 = vld [vmem:[%s2195_s2 + $0xf8] sm:$0xff] }
  0x87   : > { %938 = vmatprep.subr.bf16.mxu0 %v1779_v26  ;;  %1040 = vmatprep.subr.bf16.mxu1 %v1782_v27  ;;  %v1557_v26 = vpack.c.bf16 %v1130_v25, %v1129_v24  ;;  %v1113_v27 = vld [vmem:[%s2195_s2 + $0x70] sm:$0xff] }
  0x8a   : > { %939 = vmatpush1.bf16.msra.mxu0 %v1777_v28  ;;  %1041 = vmatpush1.bf16.msra.mxu1 %v1780_v29  ;;  %v1114_v28 = vld [vmem:[%s2195_s2 + $0x78] sm:$0xff] }
  0x8b   : > { %940 = vmatprep.subr.bf16.mxu0 %v1785_v30  ;;  %1042 = vmatprep.subr.bf16.mxu1 %v1788_v31  ;;  %v1559_v29 = vpack.c.bf16 %v1114_v28, %v1113_v27 }
  0x8e   : > { %941 = vmatpush1.bf16.msra.mxu0 %v1783_v32  ;;  %1043 = vmatpush1.bf16.msra.mxu1 %v1786_v33 }
  0x8f   : > { %942 = vmatprep.subr.bf16.mxu0 %v1793_v34  ;;  %1044 = vmatprep.subr.bf16.mxu1 %v1796_v35 }
  0x92   : > { %943 = vmatpush1.bf16.msra.mxu0 %v1791_v36  ;;  %1045 = vmatpush1.bf16.msra.mxu1 %v1794_v37 }
  0x93   : > { %944 = vmatprep.subr.bf16.mxu0 %v1799_v38  ;;  %1046 = vmatprep.subr.bf16.mxu1 %v1802_v39 }
  0x96   : > { %945 = vmatpush1.bf16.msra.mxu0 %v1797_v42  ;;  %1047 = vmatpush1.bf16.msra.mxu1 %v1800_v43 }
  0x97   : > { %1530 = vmatprep.subr.bf16.mxu0 %v1529_v45  ;;  %1561 = vmatprep.subr.bf16.mxu1 %v1529_v45 }
  0x99   : > { %961 = vmatmul.mubr.bf16.vlgmr.msra.gmra.mrb[0].mxu0 %v1803_v48  ;;  %1063 = vmatmul.mubr.bf16.vlgmr.msra.gmra.mrb[0].mxu1 %v1803_v48 }
  0x9a   : > { %1480 = vmatprep.mubr.msk.bf16.mxu0 %vm870_vm0, %v1378_v51  ;;  %1482 = vmatprep.mubr.msk.bf16.mxu1 %vm870_vm0, %v1378_v51 }
  0x9b   : > { %1532 = vmatpush3.bf16.msra.mxu0 %v1531_v52  ;;  %1569 = vmatpush3.bf16.msra.mxu1 %v1531_v52 }
  0x9c   : > { %1534 = vmatprep.subr.bf16.mxu0 %v1533_v53  ;;  %1562 = vmatprep.subr.bf16.mxu1 %v1533_v53 }
  0x9f   : > { %1536 = vmatpush3.bf16.msra.mxu0 %v1535_v58  ;;  %1570 = vmatpush3.bf16.msra.mxu1 %v1535_v58 }
  0xa0   : > { %1538 = vmatprep.subr.bf16.mxu0 %v1537_v59  ;;  %1563 = vmatprep.subr.bf16.mxu1 %v1537_v59 }
  0xa1   : > { %971 = vmatmul.mubr.bf16.gmra.mrb[4].mxu0 %v1377_v62  ;;  %1073 = vmatmul.mubr.bf16.gmra.mrb[4].mxu1 %v1377_v62 }
  0xa3   : > { %1540 = vmatpush3.bf16.msra.mxu0 %v1539_v1  ;;  %1571 = vmatpush3.bf16.msra.mxu1 %v1539_v1 }
  0xa4   : > { %1542 = vmatprep.subr.bf16.mxu0 %v1541_v2  ;;  %1564 = vmatprep.subr.bf16.mxu1 %v1541_v2 }
  0xa7   : > { %1544 = vmatpush3.bf16.msra.mxu0 %v1543_v7  ;;  %1572 = vmatpush3.bf16.msra.mxu1 %v1543_v7 }
  0xa8   : > { %1546 = vmatprep.subr.bf16.mxu0 %v1545_v8  ;;  %1565 = vmatprep.subr.bf16.mxu1 %v1545_v8 }
  0xab   : > { %1548 = vmatpush3.bf16.msra.mxu0 %v1547_v13  ;;  %1573 = vmatpush3.bf16.msra.mxu1 %v1547_v13 }
  0xac   : > { %1550 = vmatprep.subr.bf16.mxu0 %v1549_v14  ;;  %1566 = vmatprep.subr.bf16.mxu1 %v1549_v14 }
  0xaf   : > { %1552 = vmatpush3.bf16.msra.mxu0 %v1551_v19  ;;  %1574 = vmatpush3.bf16.msra.mxu1 %v1551_v19 }
  0xb0   : > { %1554 = vmatprep.subr.bf16.mxu0 %v1553_v20  ;;  %1567 = vmatprep.subr.bf16.mxu1 %v1553_v20 }
  0xb3   : > { %1556 = vmatpush3.bf16.msra.mxu0 %v1555_v23  ;;  %1575 = vmatpush3.bf16.msra.mxu1 %v1555_v23 }
  0xb4   : > { %1558 = vmatprep.subr.bf16.mxu0 %v1557_v26  ;;  %1568 = vmatprep.subr.bf16.mxu1 %v1557_v26 }
  0xb7   : > { %1560 = vmatpush3.bf16.msra.mxu0 %v1559_v29  ;;  %1576 = vmatpush3.bf16.msra.mxu1 %v1559_v29 }
 0x16c   : > { %v962_v30 = vpop.f32.mrb[0].mxu0  ;;  %v1064_v31 = vpop.f32.mrb[0].mxu1 }
 0x16d   : > { %v1081_v32 = vmul.f32 %v962_v30, %v962_v30  ;;  %v1087_v33 = vmul.f32 %v1064_v31, %v1064_v31  ;;  %v964_v34 = vpop.f32.mrb[1].mxu0  ;;  %v1066_v35 = vpop.f32.mrb[1].mxu1 }
 0x16e   : > { %v1082_v36 = vmul.f32 %v964_v34, %v964_v34  ;;  %v1088_v37 = vmul.f32 %v1066_v35, %v1066_v35  ;;  %v966_v38 = vpop.f32.mrb[2].mxu0  ;;  %v1068_v39 = vpop.f32.mrb[2].mxu1 }
 0x16f   : > { %v1093_v40 = vadd.f32 %v1087_v33, %v1081_v32  ;;  %v1083_v41 = vmul.f32 %v966_v38, %v966_v38  ;;  %v1089_v42 = vmul.f32 %v1068_v39, %v1068_v39  ;;  %v968_v43 = vpop.f32.mrb[3].mxu0  ;;  %v1070_v44 = vpop.f32.mrb[3].mxu1 }
 0x170   : > { %v1094_v45 = vadd.f32 %v1088_v37, %v1082_v36  ;;  %v1084_v46 = vmul.f32 %v968_v43, %v968_v43  ;;  %v1090_v47 = vmul.f32 %v1070_v44, %v1070_v44 }
 0x171   : > { %v1095_v48 = vadd.f32 %v1089_v42, %v1083_v41 }
 0x172   : > { %v1096_v49 = vadd.f32 %v1090_v47, %v1084_v46  ;;  %1195 = vmatprep.mubr.f32.mxu0 %v1094_v45 }
 0x173   : > { %1196 = vmatmul.mubr.f32.vlgmr.msra.gmra.mrb[8].mxu0 %v1093_v40 }
 0x174   : > { %v972_v50 = vpop.f32.mrb[4].mxu0  ;;  %v1074_v51 = vpop.f32.mrb[4].mxu1  ;;  %1200 = vmatprep.mubr.f32.mxu1 %v1096_v49 }
 0x175   : > { %v1085_v52 = vmul.f32 %v972_v50, %v972_v50  ;;  %v1091_v53 = vmul.f32 %v1074_v51, %v1074_v51  ;;  %v974_v54 = vpop.f32.mrb[5].mxu0  ;;  %v1076_v55 = vpop.f32.mrb[5].mxu1  ;;  %1201 = vmatmul.mubr.f32.vlgmr.msra.gmra.mrb[8].mxu1 %v1095_v48 }
 0x176   : > { %v1086_v56 = vmul.f32 %v974_v54, %v974_v54  ;;  %v1092_v57 = vmul.f32 %v1076_v55, %v1076_v55  ;;  %v976_v58 = vpop.f32.mrb[6].mxu0  ;;  %v1078_v59 = vpop.f32.mrb[6].mxu1 }
 0x177   : > { %v1097_v60 = vadd.f32 %v1091_v53, %v1085_v52  ;;  %v977_v61 = vpop.f32.mrb[7].mxu0  ;;  %v1079_v62 = vpop.f32.mrb[7].mxu1 }
 0x178   : > { %v1098_v63 = vadd.f32 %v1092_v57, %v1086_v56 }
 0x17a   : > { %1205 = vmatprep.mubr.f32.mxu1 %v1098_v63 }
 0x17b   : > { %1206 = vmatmul.mubr.f32.gmra.mrb[10].mxu1 %v1097_v60 }
 0x246   : > { %v1520_v0 = vpop.f32.mrb[8].mxu0 }
 0x247   : > { %v1521_v1 = vpop.f32.mrb[9].mxu0 }
 0x248   : > { %v1522_v2 = vadd.f32 %v1521_v1, %v1520_v0  ;;  %v1523_v3 = vpop.f32.mrb[8].mxu1 }
 0x249   : > { %v1524_v4 = vpop.f32.mrb[9].mxu1 }
 0x24a   : > { %v1211_v5 = vmax.f32 %v1522_v2, 1e-10  ;;  %v1525_v6 = vadd.f32 %v1524_v4, %v1523_v3 }
 0x24c   : > { %1808 = vlog2.f32 %v1211_v5  ;;  %v1212_v7 = vmax.f32 %v1525_v6, 1e-10 }
 0x24e   : > { %1810 = vlog2.f32 %v1212_v7  ;;  %v1526_v8 = vpop.f32.mrb[10].mxu1 }
 0x24f   : > { %v1527_v9 = vpop.f32.mrb[11].mxu1 }
 0x250   : > { %v1528_v10 = vadd.f32 %v1527_v9, %v1526_v8 }
 0x252   : > { %v1213_v11 = vmax.f32 %v1528_v10, 1e-10 }
 0x254   : > { %1812 = vlog2.f32 %v1213_v11 }
 0x256   : > { %v1809_v12 = vpop.eup %1808 }
 0x257   : > { %v1215_v13 = vmul.f32 0.6931472, %v1809_v12 }
 0x258   : > { %v1811_v14 = vpop.eup %1810 }
 0x259   : > { %v1220_v15 = vmul.f32 4.3429446, %v1215_v13  ;;  %v1217_v16 = vmul.f32 0.6931472, %v1811_v14 }
 0x25b   : > { %v1227_v17 = vsel %vm1223_vm1, %v1220_v15, -inf  ;;  %1224 = vst.msk [vmem:[%s209_s7] sm:$0xff] %vm1223_vm1, %v1220_v15  ;;  %v1221_v18 = vmul.f32 4.3429446, %v1217_v16 }
 0x25c   : > { %1228 = vmax.xlane.f32.xlu0 %v1227_v17 }
 0x25d   : > { %1225 = vst.msk [vmem:[%s209_s7 + $0x8] sm:$0xff] %vm1223_vm1, %v1221_v18  ;;  %v1230_v20 = vsel %vm1223_vm1, %v1221_v18, -inf }
 0x25e   : > { %v1813_v19 = vpop.eup %1812 }
 0x25f   : > { %v1219_v21 = vmul.f32 0.6931472, %v1813_v19 }
 0x260   : > { %1231 = vmax.xlane.f32.xlu0 %v1230_v20 }
 0x261   : > { %v1222_v22 = vmul.f32 4.3429446, %v1219_v21 }
 0x263   : > { %v1233_v23 = vsel %vm1223_vm1, %v1222_v22, -inf  ;;  %1226 = vst.msk [vmem:[%s209_s7 + $0x10] sm:$0xff] %vm1223_vm1, %v1222_v22 }
 0x264   : > { %1234 = vmax.xlane.f32.xlu1 %v1233_v23 }
 0x265   : > { %1855 = shalt.err (!%p1852_p7)
}
 0x266   : > { %s1856_s27 = scalar_lea.hbm %s2146_s12, 384  ;;  %s1860_s30 = scalar_lea.hbm %s2196_s3, 768 }
 0x267   : > { %p1857_p8 = scmp.ne.s32.totalorder %s2146_s12, %s1856_s27  ;;  %p1861_p1 = scmp.lt.u32.totalorder %s2146_s12, %s2196_s3 }
 0x268   : > { %p1862_p0 = scmp.lt.u32.totalorder %s1860_s30, %s1856_s27  ;;  %p1864_p6 = scmp.lt.u32.totalorder %s1856_s27, %s2146_s12 }
 0x269   : > { %p1858_p11 = pnand %p1857_p8, %p2208_p9 }
 0x26a   : > { %p1863_p5 = por %p1862_p0, %p1861_p1 }
 0x26b   : > { %p1859_p13 = pneg %p1858_p11 }
 0x26c   : > { %p1865_p10 = por %p1864_p6, %p1863_p5 }
 0x26e   : > { %p1866_p12 = pnand %p1865_p10, %p1859_p13 }
 0x270   : > { %1869 = shalt.err (!%p1866_p12)
}
 0x271   : > { %s1914_s7 = smov 128   ;;  %s1915_s9 = smov 8   ;;  %vm1236_vm2 = vcmask 7168  }
 0x272   : > { %1598 = dma.vmem_to_hbm [thread:$0]  (%p2208_p9), %s2141_s8, 384, %s2146_s12, %s2148_s13, %s1914_s7, %s1914_s7, %s1915_s9  }
 0x273   : > { %s1370_s10 = sshll.u32 %s2215_s23, 3 }
 0x274   : > { %s229_s20 = scalar_lea.vmem %s2197_s4, %s1370_s10 }
 0x2e9   : > { %v1229_v24 = vpop.xlane.xlu0 %1228 }
 0x2ea   : > { %1237 = vst.msk [vmem:[%s229_s20] sm:$0xff] %vm1236_vm2, %v1229_v24 }
 0x2ed   : > { %v1232_v25 = vpop.xlane.xlu0 %1231 }
 0x2ee   : > { %1238 = vst.msk [vmem:[%s229_s20 + $0x8] sm:$0xff] %vm1236_vm2, %v1232_v25 }
 0x2f1   : > { %v1235_v26 = vpop.xlane.xlu1 %1234 }
 0x2f2   : > { %1239 = vst.msk [vmem:[%s229_s20 + $0x10] sm:$0xff] %vm1236_vm2, %v1235_v26 }
 0x2f3 PF: > { %p1610_p2 = scmp.ge.s32.totalorder %s1908_s18, 2  ;;  %s1278_s22 = sand.u32 1, %s1896_s15  }
 0x2f4   : > { %p2209_p3 = scmp.ne.s32.totalorder %s2202_s26, 0  ;;  %s1279_s25 = scalar_lea.sflag [#allocation4], %s1278_s22 }
 0x2f6   : > { %p1605_p9 = pnand %p1610_p2, %p2209_p3 }
 0x2f8   : > { %1891 = dma.done.wait (!%p1605_p9), %s1279_s25, 384  }
 0x2f9   : > { %1893 = vsyncadd (!%p1605_p9), %s1279_s25, 4294966912  ;;  %p16_p4 = scmp.ge.s32.totalorder %s1966_s21, 4   ;;  %s2210_s15 = smov %s1900_s16 }
 0x2fa   : > { %s2211_s16 = smov %s1904_s17  ;;  %s2212_s17 = smov %s1977_s24 }
 0x2fb   : > { %s2213_s18 = smov %s1966_s21  ;;  %18 = sbr.rel (!%p16_p4) target bundleno = 4 (0x4), region = 84 }
 0x302   :  { %1292 = vsyncpa [#allocation3], 1 }
 0x303   :  { %1294 = vsyncpa [#allocation3 + $0x1], 1 }
 0x304   :  { %1295 = vsyncpa [#allocation4], 1 }
 0x305   :  { %1297 = vsyncpa [#allocation4 + $0x1], 1 }

</bundles_post_ra>
